<compile_context>
chip_gen: v7x
topology: tpu7x:2x2x1
jax: 0.10.0
libtpu: 0.0.40
codegen_flags: <defaults>
</compile_context>

<pallas_src>
import functools

import jax
import jax.numpy as jnp
from jax.experimental import pallas as pl
from jax.experimental.pallas import tpu as pltpu


def _janossy_kernel(perm_ref, x_ref, w1_ref, b1_ref, w2_ref, b2_ref, o_ref,
                    g_ref, *, num_samples, k, feat):
    """Single-invocation body (grid=(1,)); everything is VMEM-resident.

    perm_ref : (S*K,)    int32 SMEM  permutation indices (scalar prefetch)
    x_ref    : (N, F)    f32   VMEM  permutable set, fully resident
    w1_ref   : (K*F, H)  bf16  VMEM  layer-1 weight, host-reshaped, resident
    b1_ref   : (1, H)    f32
    w2_ref   : (H, O)    bf16
    b2_ref   : (1, O)    f32
    o_ref    : (1, O)    f32         pooled output
    g_ref    : (S, K*F)  f32   VMEM  gathered k-ary tuples, one row per sample
    """
    # In-kernel gather: g[s, j*F:(j+1)*F] = x[perm[s*K + j]].
    # Static store offsets, dynamic-sublane loads from the resident x block
    # (no per-row HBM DMAs).  S*K is small, so a static unroll is fine.
    for s in range(num_samples):
        for j in range(k):
            idx = perm_ref[s * k + j]
            g_ref[pl.ds(s, 1), pl.ds(j * feat, feat)] = x_ref[pl.ds(idx, 1), :]

    # Layer 1 for ALL samples in one MXU pass: (S, K*F) @ (K*F, H) -> (S, H).
    z = jnp.dot(g_ref[...].astype(jnp.bfloat16), w1_ref[...],
                preferred_element_type=jnp.float32)
    h = jnp.maximum(z + b1_ref[...], 0.0)                       # (S, H) f32

    # Mean over samples BEFORE layer 2 (linearity of the Janossy mean):
    # a single (1, H) @ (H, O) matmul + one bias add + one cast.
    h_mean = jnp.sum(h, axis=0, keepdims=True) * (1.0 / num_samples)
    out = jnp.dot(h_mean.astype(jnp.bfloat16), w2_ref[...],
                  preferred_element_type=jnp.float32) + b2_ref[...]
    o_ref[...] = out.astype(o_ref.dtype)


def janossy_pool(x, perms, params, *, num_samples, k):
    """JanossyPool.forward with module = relu(Linear(k*F->H)) -> Linear(H->O)."""
    N, F = x.shape
    H = params["w1"].shape[-1]
    O = params["w2"].shape[-1]

    x_f32 = x.astype(jnp.float32)
    w1 = params["w1"].astype(jnp.bfloat16).reshape(k * F, H)    # resident, pre-flattened
    w2 = params["w2"].astype(jnp.bfloat16)
    b1 = params["b1"].astype(jnp.float32)
    b2 = params["b2"].astype(jnp.float32)
    perms_flat = perms.reshape(-1).astype(jnp.int32)            # (S*K,)

    kernel = functools.partial(_janossy_kernel,
                               num_samples=num_samples, k=k, feat=F)

    grid_spec = pltpu.PrefetchScalarGridSpec(
        num_scalar_prefetch=1,
        grid=(1,),                                              # single step; all resident
        in_specs=[
            pl.BlockSpec((N, F), lambda i, perm: (0, 0)),       # x (f32, 8 KiB)
            pl.BlockSpec((k * F, H), lambda i, perm: (0, 0)),   # W1 flat (bf16, 256 KiB)
            pl.BlockSpec((1, H), lambda i, perm: (0, 0)),       # b1
            pl.BlockSpec((H, O), lambda i, perm: (0, 0)),       # W2 (bf16, 32 KiB)
            pl.BlockSpec((1, O), lambda i, perm: (0, 0)),       # b2
        ],
        out_specs=pl.BlockSpec((1, O), lambda i, perm: (0, 0)),
        scratch_shapes=[
            pltpu.VMEM((num_samples, k * F), jnp.float32),      # gathered tuples
        ],
    )

    out = pl.pallas_call(
        kernel,
        out_shape=jax.ShapeDtypeStruct((1, O), jnp.float32),
        grid_spec=grid_spec,
        compiler_params=pltpu.CompilerParams(
            dimension_semantics=("arbitrary",),
        ),
    )(perms_flat, x_f32, w1, b1, w2, b2)
    return out[0]                                               # (O,)


def _reference(x, perms, params, *, num_samples, k):
    """Pure-JAX reference mirroring the kernel's bf16 quantization points."""
    F = x.shape[1]
    H = params["w1"].shape[-1]
    xq = x.astype(jnp.bfloat16).astype(jnp.float32)
    w1 = params["w1"].astype(jnp.bfloat16).astype(jnp.float32).reshape(k * F, H)
    w2 = params["w2"].astype(jnp.bfloat16).astype(jnp.float32)
    b1, b2 = params["b1"], params["b2"]
    h_sum = jnp.zeros((1, H), jnp.float32)
    for s in range(num_samples):
        vec = xq[perms[s]].reshape(1, k * F)                    # k-ary tuple, flattened
        h_sum = h_sum + jnp.maximum(vec @ w1 + b1, 0.0)
    h_mean = (h_sum / num_samples).astype(jnp.bfloat16).astype(jnp.float32)
    return (h_mean @ w2 + b2)[0]


if __name__ == "__main__":
    # Small shapes, but lane-dense (128) on feature / hidden / output dims.
    N, F, K, H, O, S = 16, 128, 8, 128, 128, 4

    key = jax.random.PRNGKey(0)
    k_x, k_w1, k_b1, k_w2, k_b2, k_perm = jax.random.split(key, 6)

    # The permutable set: N items with F features each.
    x = jax.random.normal(k_x, (N, F), jnp.float32)

    # Deterministic nn.Linear-style init: U(-1/sqrt(fan_in), 1/sqrt(fan_in)).
    bound1 = (K * F) ** -0.5
    w1 = jax.random.uniform(k_w1, (K * F, H), jnp.float32, -bound1, bound1).reshape(K, F, H)
    b1 = jax.random.uniform(k_b1, (1, H), jnp.float32, -bound1, bound1)
    bound2 = H ** -0.5
    w2 = jax.random.uniform(k_w2, (H, O), jnp.float32, -bound2, bound2)
    b2 = jax.random.uniform(k_b2, (1, O), jnp.float32, -bound2, bound2)
    params = {"w1": w1, "b1": b1, "w2": w2, "b2": b2}

    # num_samples permutations of arange(N); only the first k entries are used.
    perm_keys = jax.random.split(k_perm, S)
    perms = jnp.stack(
        [jax.random.permutation(perm_keys[s], N)[:K] for s in range(S)]
    ).astype(jnp.int32)                                         # (S, K)

    out = janossy_pool(x, perms, params, num_samples=S, k=K)
    out = jax.block_until_ready(out)

    ref = _reference(x, perms, params, num_samples=S, k=K)
    assert out.shape == (O,)
    assert jnp.allclose(out, ref, atol=2e-2, rtol=2e-2), "mismatch vs reference"

    print("KERNEL_OK")
</pallas_src>

<mosaic_0001>
module attributes {stable_mosaic.version = 11 : i64} {
  func.func @_janossy_kernel(%arg0: i32, %arg1: memref<32xi32, #tpu.memory_space<smem>>, %arg2: memref<16x128xf32, #tpu.memory_space<vmem>>, %arg3: memref<1024x128xbf16, #tpu.memory_space<vmem>>, %arg4: memref<1x128xf32, #tpu.memory_space<vmem>>, %arg5: memref<128x128xbf16, #tpu.memory_space<vmem>>, %arg6: memref<1x128xf32, #tpu.memory_space<vmem>>, %arg7: memref<1x128xf32, #tpu.memory_space<vmem>>, %arg8: memref<4x1024xf32, #tpu.memory_space<vmem>>) attributes {dimension_semantics = [#tpu.dimension_semantics<arbitrary>], iteration_bounds = array<i64: 1>, scalar_prefetch = 1 : i64, scratch_operands = 1 : i64, tpu.core_type = #tpu.core_type<tc>, window_params = [{pipeline_mode = #tpu.pipeline_mode<synchronous>, transform_indices = @transform_0, window_bounds = array<i64: 16, 128>}, {pipeline_mode = #tpu.pipeline_mode<synchronous>, transform_indices = @transform_1, window_bounds = array<i64: 1024, 128>}, {pipeline_mode = #tpu.pipeline_mode<synchronous>, transform_indices = @transform_2, window_bounds = array<i64: 1, 128>}, {pipeline_mode = #tpu.pipeline_mode<synchronous>, transform_indices = @transform_3, window_bounds = array<i64: 128, 128>}, {pipeline_mode = #tpu.pipeline_mode<synchronous>, transform_indices = @transform_4, window_bounds = array<i64: 1, 128>}, {pipeline_mode = #tpu.pipeline_mode<synchronous>, transform_indices = @transform_5, window_bounds = array<i64: 1, 128>}]} {
    %c0 = arith.constant 0 : index
    %0 = memref.load %arg1[%c0] : memref<32xi32, #tpu.memory_space<smem>>
    %1 = arith.index_cast %0 : i32 to index
    %c0_0 = arith.constant 0 : index
    %2 = vector.load %arg2[%1, %c0_0] : memref<16x128xf32, #tpu.memory_space<vmem>>, vector<1x128xf32>
    %c0_1 = arith.constant 0 : index
    %c0_2 = arith.constant 0 : index
    %3 = vector.load %arg8[%c0_1, %c0_2] : memref<4x1024xf32, #tpu.memory_space<vmem>>, vector<1x128xf32>
    tpu.vector_store %arg8[%c0_1, %c0_2], %2 {strides = array<i32>} : memref<4x1024xf32, #tpu.memory_space<vmem>>, vector<1x128xf32>,
    %c1 = arith.constant 1 : index
    %4 = memref.load %arg1[%c1] : memref<32xi32, #tpu.memory_space<smem>>
    %5 = arith.index_cast %4 : i32 to index
    %c0_3 = arith.constant 0 : index
    %6 = vector.load %arg2[%5, %c0_3] : memref<16x128xf32, #tpu.memory_space<vmem>>, vector<1x128xf32>
    %c0_4 = arith.constant 0 : index
    %c128 = arith.constant 128 : index
    %7 = vector.load %arg8[%c0_4, %c128] : memref<4x1024xf32, #tpu.memory_space<vmem>>, vector<1x128xf32>
    tpu.vector_store %arg8[%c0_4, %c128], %6 {strides = array<i32>} : memref<4x1024xf32, #tpu.memory_space<vmem>>, vector<1x128xf32>,
    %c2 = arith.constant 2 : index
    %8 = memref.load %arg1[%c2] : memref<32xi32, #tpu.memory_space<smem>>
    %9 = arith.index_cast %8 : i32 to index
    %c0_5 = arith.constant 0 : index
    %10 = vector.load %arg2[%9, %c0_5] : memref<16x128xf32, #tpu.memory_space<vmem>>, vector<1x128xf32>
    %c0_6 = arith.constant 0 : index
    %c256 = arith.constant 256 : index
    %11 = vector.load %arg8[%c0_6, %c256] : memref<4x1024xf32, #tpu.memory_space<vmem>>, vector<1x128xf32>
    tpu.vector_store %arg8[%c0_6, %c256], %10 {strides = array<i32>} : memref<4x1024xf32, #tpu.memory_space<vmem>>, vector<1x128xf32>,
    %c3 = arith.constant 3 : index
    %12 = memref.load %arg1[%c3] : memref<32xi32, #tpu.memory_space<smem>>
    %13 = arith.index_cast %12 : i32 to index
    %c0_7 = arith.constant 0 : index
    %14 = vector.load %arg2[%13, %c0_7] : memref<16x128xf32, #tpu.memory_space<vmem>>, vector<1x128xf32>
    %c0_8 = arith.constant 0 : index
    %c384 = arith.constant 384 : index
    %15 = vector.load %arg8[%c0_8, %c384] : memref<4x1024xf32, #tpu.memory_space<vmem>>, vector<1x128xf32>
    tpu.vector_store %arg8[%c0_8, %c384], %14 {strides = array<i32>} : memref<4x1024xf32, #tpu.memory_space<vmem>>, vector<1x128xf32>,
    %c4 = arith.constant 4 : index
    %16 = memref.load %arg1[%c4] : memref<32xi32, #tpu.memory_space<smem>>
    %17 = arith.index_cast %16 : i32 to index
    %c0_9 = arith.constant 0 : index
    %18 = vector.load %arg2[%17, %c0_9] : memref<16x128xf32, #tpu.memory_space<vmem>>, vector<1x128xf32>
    %c0_10 = arith.constant 0 : index
    %c512 = arith.constant 512 : index
    %19 = vector.load %arg8[%c0_10, %c512] : memref<4x1024xf32, #tpu.memory_space<vmem>>, vector<1x128xf32>
    tpu.vector_store %arg8[%c0_10, %c512], %18 {strides = array<i32>} : memref<4x1024xf32, #tpu.memory_space<vmem>>, vector<1x128xf32>,
    %c5 = arith.constant 5 : index
    %20 = memref.load %arg1[%c5] : memref<32xi32, #tpu.memory_space<smem>>
    %21 = arith.index_cast %20 : i32 to index
    %c0_11 = arith.constant 0 : index
    %22 = vector.load %arg2[%21, %c0_11] : memref<16x128xf32, #tpu.memory_space<vmem>>, vector<1x128xf32>
    %c0_12 = arith.constant 0 : index
    %c640 = arith.constant 640 : index
    %23 = vector.load %arg8[%c0_12, %c640] : memref<4x1024xf32, #tpu.memory_space<vmem>>, vector<1x128xf32>
    tpu.vector_store %arg8[%c0_12, %c640], %22 {strides = array<i32>} : memref<4x1024xf32, #tpu.memory_space<vmem>>, vector<1x128xf32>,
    %c6 = arith.constant 6 : index
    %24 = memref.load %arg1[%c6] : memref<32xi32, #tpu.memory_space<smem>>
    %25 = arith.index_cast %24 : i32 to index
    %c0_13 = arith.constant 0 : index
    %26 = vector.load %arg2[%25, %c0_13] : memref<16x128xf32, #tpu.memory_space<vmem>>, vector<1x128xf32>
    %c0_14 = arith.constant 0 : index
    %c768 = arith.constant 768 : index
    %27 = vector.load %arg8[%c0_14, %c768] : memref<4x1024xf32, #tpu.memory_space<vmem>>, vector<1x128xf32>
    tpu.vector_store %arg8[%c0_14, %c768], %26 {strides = array<i32>} : memref<4x1024xf32, #tpu.memory_space<vmem>>, vector<1x128xf32>,
    %c7 = arith.constant 7 : index
    %28 = memref.load %arg1[%c7] : memref<32xi32, #tpu.memory_space<smem>>
    %29 = arith.index_cast %28 : i32 to index
    %c0_15 = arith.constant 0 : index
    %30 = vector.load %arg2[%29, %c0_15] : memref<16x128xf32, #tpu.memory_space<vmem>>, vector<1x128xf32>
    %c0_16 = arith.constant 0 : index
    %c896 = arith.constant 896 : index
    %31 = vector.load %arg8[%c0_16, %c896] : memref<4x1024xf32, #tpu.memory_space<vmem>>, vector<1x128xf32>
    tpu.vector_store %arg8[%c0_16, %c896], %30 {strides = array<i32>} : memref<4x1024xf32, #tpu.memory_space<vmem>>, vector<1x128xf32>,
    %c8 = arith.constant 8 : index
    %32 = memref.load %arg1[%c8] : memref<32xi32, #tpu.memory_space<smem>>
    %33 = arith.index_cast %32 : i32 to index
    %c0_17 = arith.constant 0 : index
    %34 = vector.load %arg2[%33, %c0_17] : memref<16x128xf32, #tpu.memory_space<vmem>>, vector<1x128xf32>
    %c1_18 = arith.constant 1 : index
    %c0_19 = arith.constant 0 : index
    %35 = vector.load %arg8[%c1_18, %c0_19] : memref<4x1024xf32, #tpu.memory_space<vmem>>, vector<1x128xf32>
    tpu.vector_store %arg8[%c1_18, %c0_19], %34 {strides = array<i32>} : memref<4x1024xf32, #tpu.memory_space<vmem>>, vector<1x128xf32>,
    %c9 = arith.constant 9 : index
    %36 = memref.load %arg1[%c9] : memref<32xi32, #tpu.memory_space<smem>>
    %37 = arith.index_cast %36 : i32 to index
    %c0_20 = arith.constant 0 : index
    %38 = vector.load %arg2[%37, %c0_20] : memref<16x128xf32, #tpu.memory_space<vmem>>, vector<1x128xf32>
    %c1_21 = arith.constant 1 : index
    %c128_22 = arith.constant 128 : index
    %39 = vector.load %arg8[%c1_21, %c128_22] : memref<4x1024xf32, #tpu.memory_space<vmem>>, vector<1x128xf32>
    tpu.vector_store %arg8[%c1_21, %c128_22], %38 {strides = array<i32>} : memref<4x1024xf32, #tpu.memory_space<vmem>>, vector<1x128xf32>,
    %c10 = arith.constant 10 : index
    %40 = memref.load %arg1[%c10] : memref<32xi32, #tpu.memory_space<smem>>
    %41 = arith.index_cast %40 : i32 to index
    %c0_23 = arith.constant 0 : index
    %42 = vector.load %arg2[%41, %c0_23] : memref<16x128xf32, #tpu.memory_space<vmem>>, vector<1x128xf32>
    %c1_24 = arith.constant 1 : index
    %c256_25 = arith.constant 256 : index
    %43 = vector.load %arg8[%c1_24, %c256_25] : memref<4x1024xf32, #tpu.memory_space<vmem>>, vector<1x128xf32>
    tpu.vector_store %arg8[%c1_24, %c256_25], %42 {strides = array<i32>} : memref<4x1024xf32, #tpu.memory_space<vmem>>, vector<1x128xf32>,
    %c11 = arith.constant 11 : index
    %44 = memref.load %arg1[%c11] : memref<32xi32, #tpu.memory_space<smem>>
    %45 = arith.index_cast %44 : i32 to index
    %c0_26 = arith.constant 0 : index
    %46 = vector.load %arg2[%45, %c0_26] : memref<16x128xf32, #tpu.memory_space<vmem>>, vector<1x128xf32>
    %c1_27 = arith.constant 1 : index
    %c384_28 = arith.constant 384 : index
    %47 = vector.load %arg8[%c1_27, %c384_28] : memref<4x1024xf32, #tpu.memory_space<vmem>>, vector<1x128xf32>
    tpu.vector_store %arg8[%c1_27, %c384_28], %46 {strides = array<i32>} : memref<4x1024xf32, #tpu.memory_space<vmem>>, vector<1x128xf32>,
    %c12 = arith.constant 12 : index
    %48 = memref.load %arg1[%c12] : memref<32xi32, #tpu.memory_space<smem>>
    %49 = arith.index_cast %48 : i32 to index
    %c0_29 = arith.constant 0 : index
    %50 = vector.load %arg2[%49, %c0_29] : memref<16x128xf32, #tpu.memory_space<vmem>>, vector<1x128xf32>
    %c1_30 = arith.constant 1 : index
    %c512_31 = arith.constant 512 : index
    %51 = vector.load %arg8[%c1_30, %c512_31] : memref<4x1024xf32, #tpu.memory_space<vmem>>, vector<1x128xf32>
    tpu.vector_store %arg8[%c1_30, %c512_31], %50 {strides = array<i32>} : memref<4x1024xf32, #tpu.memory_space<vmem>>, vector<1x128xf32>,
    %c13 = arith.constant 13 : index
    %52 = memref.load %arg1[%c13] : memref<32xi32, #tpu.memory_space<smem>>
    %53 = arith.index_cast %52 : i32 to index
    %c0_32 = arith.constant 0 : index
    %54 = vector.load %arg2[%53, %c0_32] : memref<16x128xf32, #tpu.memory_space<vmem>>, vector<1x128xf32>
    %c1_33 = arith.constant 1 : index
    %c640_34 = arith.constant 640 : index
    %55 = vector.load %arg8[%c1_33, %c640_34] : memref<4x1024xf32, #tpu.memory_space<vmem>>, vector<1x128xf32>
    tpu.vector_store %arg8[%c1_33, %c640_34], %54 {strides = array<i32>} : memref<4x1024xf32, #tpu.memory_space<vmem>>, vector<1x128xf32>,
    %c14 = arith.constant 14 : index
    %56 = memref.load %arg1[%c14] : memref<32xi32, #tpu.memory_space<smem>>
    %57 = arith.index_cast %56 : i32 to index
    %c0_35 = arith.constant 0 : index
    %58 = vector.load %arg2[%57, %c0_35] : memref<16x128xf32, #tpu.memory_space<vmem>>, vector<1x128xf32>
    %c1_36 = arith.constant 1 : index
    %c768_37 = arith.constant 768 : index
    %59 = vector.load %arg8[%c1_36, %c768_37] : memref<4x1024xf32, #tpu.memory_space<vmem>>, vector<1x128xf32>
    tpu.vector_store %arg8[%c1_36, %c768_37], %58 {strides = array<i32>} : memref<4x1024xf32, #tpu.memory_space<vmem>>, vector<1x128xf32>,
    %c15 = arith.constant 15 : index
    %60 = memref.load %arg1[%c15] : memref<32xi32, #tpu.memory_space<smem>>
    %61 = arith.index_cast %60 : i32 to index
    %c0_38 = arith.constant 0 : index
    %62 = vector.load %arg2[%61, %c0_38] : memref<16x128xf32, #tpu.memory_space<vmem>>, vector<1x128xf32>
    %c1_39 = arith.constant 1 : index
    %c896_40 = arith.constant 896 : index
    %63 = vector.load %arg8[%c1_39, %c896_40] : memref<4x1024xf32, #tpu.memory_space<vmem>>, vector<1x128xf32>
    tpu.vector_store %arg8[%c1_39, %c896_40], %62 {strides = array<i32>} : memref<4x1024xf32, #tpu.memory_space<vmem>>, vector<1x128xf32>,
    %c16 = arith.constant 16 : index
    %64 = memref.load %arg1[%c16] : memref<32xi32, #tpu.memory_space<smem>>
    %65 = arith.index_cast %64 : i32 to index
    %c0_41 = arith.constant 0 : index
    %66 = vector.load %arg2[%65, %c0_41] : memref<16x128xf32, #tpu.memory_space<vmem>>, vector<1x128xf32>
    %c2_42 = arith.constant 2 : index
    %c0_43 = arith.constant 0 : index
    %67 = vector.load %arg8[%c2_42, %c0_43] : memref<4x1024xf32, #tpu.memory_space<vmem>>, vector<1x128xf32>
    tpu.vector_store %arg8[%c2_42, %c0_43], %66 {strides = array<i32>} : memref<4x1024xf32, #tpu.memory_space<vmem>>, vector<1x128xf32>,
    %c17 = arith.constant 17 : index
    %68 = memref.load %arg1[%c17] : memref<32xi32, #tpu.memory_space<smem>>
    %69 = arith.index_cast %68 : i32 to index
    %c0_44 = arith.constant 0 : index
    %70 = vector.load %arg2[%69, %c0_44] : memref<16x128xf32, #tpu.memory_space<vmem>>, vector<1x128xf32>
    %c2_45 = arith.constant 2 : index
    %c128_46 = arith.constant 128 : index
    %71 = vector.load %arg8[%c2_45, %c128_46] : memref<4x1024xf32, #tpu.memory_space<vmem>>, vector<1x128xf32>
    tpu.vector_store %arg8[%c2_45, %c128_46], %70 {strides = array<i32>} : memref<4x1024xf32, #tpu.memory_space<vmem>>, vector<1x128xf32>,
    %c18 = arith.constant 18 : index
    %72 = memref.load %arg1[%c18] : memref<32xi32, #tpu.memory_space<smem>>
    %73 = arith.index_cast %72 : i32 to index
    %c0_47 = arith.constant 0 : index
    %74 = vector.load %arg2[%73, %c0_47] : memref<16x128xf32, #tpu.memory_space<vmem>>, vector<1x128xf32>
    %c2_48 = arith.constant 2 : index
    %c256_49 = arith.constant 256 : index
    %75 = vector.load %arg8[%c2_48, %c256_49] : memref<4x1024xf32, #tpu.memory_space<vmem>>, vector<1x128xf32>
    tpu.vector_store %arg8[%c2_48, %c256_49], %74 {strides = array<i32>} : memref<4x1024xf32, #tpu.memory_space<vmem>>, vector<1x128xf32>,
    %c19 = arith.constant 19 : index
    %76 = memref.load %arg1[%c19] : memref<32xi32, #tpu.memory_space<smem>>
    %77 = arith.index_cast %76 : i32 to index
    %c0_50 = arith.constant 0 : index
    %78 = vector.load %arg2[%77, %c0_50] : memref<16x128xf32, #tpu.memory_space<vmem>>, vector<1x128xf32>
    %c2_51 = arith.constant 2 : index
    %c384_52 = arith.constant 384 : index
    %79 = vector.load %arg8[%c2_51, %c384_52] : memref<4x1024xf32, #tpu.memory_space<vmem>>, vector<1x128xf32>
    tpu.vector_store %arg8[%c2_51, %c384_52], %78 {strides = array<i32>} : memref<4x1024xf32, #tpu.memory_space<vmem>>, vector<1x128xf32>,
    %c20 = arith.constant 20 : index
    %80 = memref.load %arg1[%c20] : memref<32xi32, #tpu.memory_space<smem>>
    %81 = arith.index_cast %80 : i32 to index
    %c0_53 = arith.constant 0 : index
    %82 = vector.load %arg2[%81, %c0_53] : memref<16x128xf32, #tpu.memory_space<vmem>>, vector<1x128xf32>
    %c2_54 = arith.constant 2 : index
    %c512_55 = arith.constant 512 : index
    %83 = vector.load %arg8[%c2_54, %c512_55] : memref<4x1024xf32, #tpu.memory_space<vmem>>, vector<1x128xf32>
    tpu.vector_store %arg8[%c2_54, %c512_55], %82 {strides = array<i32>} : memref<4x1024xf32, #tpu.memory_space<vmem>>, vector<1x128xf32>,
    %c21 = arith.constant 21 : index
    %84 = memref.load %arg1[%c21] : memref<32xi32, #tpu.memory_space<smem>>
    %85 = arith.index_cast %84 : i32 to index
    %c0_56 = arith.constant 0 : index
    %86 = vector.load %arg2[%85, %c0_56] : memref<16x128xf32, #tpu.memory_space<vmem>>, vector<1x128xf32>
    %c2_57 = arith.constant 2 : index
    %c640_58 = arith.constant 640 : index
    %87 = vector.load %arg8[%c2_57, %c640_58] : memref<4x1024xf32, #tpu.memory_space<vmem>>, vector<1x128xf32>
    tpu.vector_store %arg8[%c2_57, %c640_58], %86 {strides = array<i32>} : memref<4x1024xf32, #tpu.memory_space<vmem>>, vector<1x128xf32>,
    %c22 = arith.constant 22 : index
    %88 = memref.load %arg1[%c22] : memref<32xi32, #tpu.memory_space<smem>>
    %89 = arith.index_cast %88 : i32 to index
    %c0_59 = arith.constant 0 : index
    %90 = vector.load %arg2[%89, %c0_59] : memref<16x128xf32, #tpu.memory_space<vmem>>, vector<1x128xf32>
    %c2_60 = arith.constant 2 : index
    %c768_61 = arith.constant 768 : index
    %91 = vector.load %arg8[%c2_60, %c768_61] : memref<4x1024xf32, #tpu.memory_space<vmem>>, vector<1x128xf32>
    tpu.vector_store %arg8[%c2_60, %c768_61], %90 {strides = array<i32>} : memref<4x1024xf32, #tpu.memory_space<vmem>>, vector<1x128xf32>,
    %c23 = arith.constant 23 : index
    %92 = memref.load %arg1[%c23] : memref<32xi32, #tpu.memory_space<smem>>
    %93 = arith.index_cast %92 : i32 to index
    %c0_62 = arith.constant 0 : index
    %94 = vector.load %arg2[%93, %c0_62] : memref<16x128xf32, #tpu.memory_space<vmem>>, vector<1x128xf32>
    %c2_63 = arith.constant 2 : index
    %c896_64 = arith.constant 896 : index
    %95 = vector.load %arg8[%c2_63, %c896_64] : memref<4x1024xf32, #tpu.memory_space<vmem>>, vector<1x128xf32>
    tpu.vector_store %arg8[%c2_63, %c896_64], %94 {strides = array<i32>} : memref<4x1024xf32, #tpu.memory_space<vmem>>, vector<1x128xf32>,
    %c24 = arith.constant 24 : index
    %96 = memref.load %arg1[%c24] : memref<32xi32, #tpu.memory_space<smem>>
    %97 = arith.index_cast %96 : i32 to index
    %c0_65 = arith.constant 0 : index
    %98 = vector.load %arg2[%97, %c0_65] : memref<16x128xf32, #tpu.memory_space<vmem>>, vector<1x128xf32>
    %c3_66 = arith.constant 3 : index
    %c0_67 = arith.constant 0 : index
    %99 = vector.load %arg8[%c3_66, %c0_67] : memref<4x1024xf32, #tpu.memory_space<vmem>>, vector<1x128xf32>
    tpu.vector_store %arg8[%c3_66, %c0_67], %98 {strides = array<i32>} : memref<4x1024xf32, #tpu.memory_space<vmem>>, vector<1x128xf32>,
    %c25 = arith.constant 25 : index
    %100 = memref.load %arg1[%c25] : memref<32xi32, #tpu.memory_space<smem>>
    %101 = arith.index_cast %100 : i32 to index
    %c0_68 = arith.constant 0 : index
    %102 = vector.load %arg2[%101, %c0_68] : memref<16x128xf32, #tpu.memory_space<vmem>>, vector<1x128xf32>
    %c3_69 = arith.constant 3 : index
    %c128_70 = arith.constant 128 : index
    %103 = vector.load %arg8[%c3_69, %c128_70] : memref<4x1024xf32, #tpu.memory_space<vmem>>, vector<1x128xf32>
    tpu.vector_store %arg8[%c3_69, %c128_70], %102 {strides = array<i32>} : memref<4x1024xf32, #tpu.memory_space<vmem>>, vector<1x128xf32>,
    %c26 = arith.constant 26 : index
    %104 = memref.load %arg1[%c26] : memref<32xi32, #tpu.memory_space<smem>>
    %105 = arith.index_cast %104 : i32 to index
    %c0_71 = arith.constant 0 : index
    %106 = vector.load %arg2[%105, %c0_71] : memref<16x128xf32, #tpu.memory_space<vmem>>, vector<1x128xf32>
    %c3_72 = arith.constant 3 : index
    %c256_73 = arith.constant 256 : index
    %107 = vector.load %arg8[%c3_72, %c256_73] : memref<4x1024xf32, #tpu.memory_space<vmem>>, vector<1x128xf32>
    tpu.vector_store %arg8[%c3_72, %c256_73], %106 {strides = array<i32>} : memref<4x1024xf32, #tpu.memory_space<vmem>>, vector<1x128xf32>,
    %c27 = arith.constant 27 : index
    %108 = memref.load %arg1[%c27] : memref<32xi32, #tpu.memory_space<smem>>
    %109 = arith.index_cast %108 : i32 to index
    %c0_74 = arith.constant 0 : index
    %110 = vector.load %arg2[%109, %c0_74] : memref<16x128xf32, #tpu.memory_space<vmem>>, vector<1x128xf32>
    %c3_75 = arith.constant 3 : index
    %c384_76 = arith.constant 384 : index
    %111 = vector.load %arg8[%c3_75, %c384_76] : memref<4x1024xf32, #tpu.memory_space<vmem>>, vector<1x128xf32>
    tpu.vector_store %arg8[%c3_75, %c384_76], %110 {strides = array<i32>} : memref<4x1024xf32, #tpu.memory_space<vmem>>, vector<1x128xf32>,
    %c28 = arith.constant 28 : index
    %112 = memref.load %arg1[%c28] : memref<32xi32, #tpu.memory_space<smem>>
    %113 = arith.index_cast %112 : i32 to index
    %c0_77 = arith.constant 0 : index
    %114 = vector.load %arg2[%113, %c0_77] : memref<16x128xf32, #tpu.memory_space<vmem>>, vector<1x128xf32>
    %c3_78 = arith.constant 3 : index
    %c512_79 = arith.constant 512 : index
    %115 = vector.load %arg8[%c3_78, %c512_79] : memref<4x1024xf32, #tpu.memory_space<vmem>>, vector<1x128xf32>
    tpu.vector_store %arg8[%c3_78, %c512_79], %114 {strides = array<i32>} : memref<4x1024xf32, #tpu.memory_space<vmem>>, vector<1x128xf32>,
    %c29 = arith.constant 29 : index
    %116 = memref.load %arg1[%c29] : memref<32xi32, #tpu.memory_space<smem>>
    %117 = arith.index_cast %116 : i32 to index
    %c0_80 = arith.constant 0 : index
    %118 = vector.load %arg2[%117, %c0_80] : memref<16x128xf32, #tpu.memory_space<vmem>>, vector<1x128xf32>
    %c3_81 = arith.constant 3 : index
    %c640_82 = arith.constant 640 : index
    %119 = vector.load %arg8[%c3_81, %c640_82] : memref<4x1024xf32, #tpu.memory_space<vmem>>, vector<1x128xf32>
    tpu.vector_store %arg8[%c3_81, %c640_82], %118 {strides = array<i32>} : memref<4x1024xf32, #tpu.memory_space<vmem>>, vector<1x128xf32>,
    %c30 = arith.constant 30 : index
    %120 = memref.load %arg1[%c30] : memref<32xi32, #tpu.memory_space<smem>>
    %121 = arith.index_cast %120 : i32 to index
    %c0_83 = arith.constant 0 : index
    %122 = vector.load %arg2[%121, %c0_83] : memref<16x128xf32, #tpu.memory_space<vmem>>, vector<1x128xf32>
    %c3_84 = arith.constant 3 : index
    %c768_85 = arith.constant 768 : index
    %123 = vector.load %arg8[%c3_84, %c768_85] : memref<4x1024xf32, #tpu.memory_space<vmem>>, vector<1x128xf32>
    tpu.vector_store %arg8[%c3_84, %c768_85], %122 {strides = array<i32>} : memref<4x1024xf32, #tpu.memory_space<vmem>>, vector<1x128xf32>,
    %c31 = arith.constant 31 : index
    %124 = memref.load %arg1[%c31] : memref<32xi32, #tpu.memory_space<smem>>
    %125 = arith.index_cast %124 : i32 to index
    %c0_86 = arith.constant 0 : index
    %126 = vector.load %arg2[%125, %c0_86] : memref<16x128xf32, #tpu.memory_space<vmem>>, vector<1x128xf32>
    %c3_87 = arith.constant 3 : index
    %c896_88 = arith.constant 896 : index
    %127 = vector.load %arg8[%c3_87, %c896_88] : memref<4x1024xf32, #tpu.memory_space<vmem>>, vector<1x128xf32>
    tpu.vector_store %arg8[%c3_87, %c896_88], %126 {strides = array<i32>} : memref<4x1024xf32, #tpu.memory_space<vmem>>, vector<1x128xf32>,
    %c0_89 = arith.constant 0 : index
    %c0_90 = arith.constant 0 : index
    %128 = vector.load %arg8[%c0_89, %c0_90] : memref<4x1024xf32, #tpu.memory_space<vmem>>, vector<4x1024xf32>
    %129 = arith.truncf %128 : vector<4x1024xf32> to vector<4x1024xbf16>
    %c0_91 = arith.constant 0 : index
    %c0_92 = arith.constant 0 : index
    %130 = vector.load %arg3[%c0_91, %c0_92] : memref<1024x128xbf16, #tpu.memory_space<vmem>>, vector<1024x128xbf16>
    %cst = arith.constant dense<0.000000e+00> : vector<4x128xf32>
    %131 = tpu.matmul %129, %130, %cst {dimension_numbers = #tpu.dot_dimension_numbers<[1], [0], [0], [1], [0, 0, 1, 1], [], []>} : vector<4x1024xbf16>, vector<1024x128xbf16>, vector<4x128xf32> -> vector<4x128xf32>
    %c0_93 = arith.constant 0 : index
    %c0_94 = arith.constant 0 : index
    %132 = vector.load %arg4[%c0_93, %c0_94] : memref<1x128xf32, #tpu.memory_space<vmem>>, vector<1x128xf32>
    %133 = vector.broadcast %132 : vector<1x128xf32> to vector<4x128xf32>
    %134 = arith.addf %131, %133 : vector<4x128xf32>
    %cst_95 = arith.constant 0.000000e+00 : f32
    %135 = vector.broadcast %cst_95 : f32 to vector<4x128xf32>
    %136 = arith.maximumf %134, %135 : vector<4x128xf32>
    %cst_96 = arith.constant dense<0.000000e+00> : vector<128xf32>
    %137 = vector.multi_reduction <add>, %136, %cst_96 [0] : vector<4x128xf32> to vector<128xf32>
    %138 = vector.shape_cast %137 : vector<128xf32> to vector<1x128xf32>
    %cst_97 = arith.constant 2.500000e-01 : f32
    %139 = vector.broadcast %cst_97 : f32 to vector<1x128xf32>
    %140 = arith.mulf %138, %139 : vector<1x128xf32>
    %141 = arith.truncf %140 : vector<1x128xf32> to vector<1x128xbf16>
    %c0_98 = arith.constant 0 : index
    %c0_99 = arith.constant 0 : index
    %142 = vector.load %arg5[%c0_98, %c0_99] : memref<128x128xbf16, #tpu.memory_space<vmem>>, vector<128x128xbf16>
    %cst_100 = arith.constant dense<0.000000e+00> : vector<1x128xf32>
    %143 = tpu.matmul %141, %142, %cst_100 {dimension_numbers = #tpu.dot_dimension_numbers<[1], [0], [0], [1], [0, 0, 1, 1], [], []>} : vector<1x128xbf16>, vector<128x128xbf16>, vector<1x128xf32> -> vector<1x128xf32>
    %c0_101 = arith.constant 0 : index
    %c0_102 = arith.constant 0 : index
    %144 = vector.load %arg6[%c0_101, %c0_102] : memref<1x128xf32, #tpu.memory_space<vmem>>, vector<1x128xf32>
    %145 = arith.addf %143, %144 : vector<1x128xf32>
    %c0_103 = arith.constant 0 : index
    %c0_104 = arith.constant 0 : index
    %146 = vector.load %arg7[%c0_103, %c0_104] : memref<1x128xf32, #tpu.memory_space<vmem>>, vector<1x128xf32>
    tpu.vector_store %arg7[%c0_103, %c0_104], %145 {strides = array<i32>} : memref<1x128xf32, #tpu.memory_space<vmem>>, vector<1x128xf32>,
    return
  }
  func.func @transform_0(%arg0: i32, %arg1: memref<32xi32, #tpu.memory_space<smem>>) -> (i32, i32) {
    %c0_i32 = arith.constant 0 : i32
    %c0_i32_0 = arith.constant 0 : i32
    %c0_i32_1 = arith.constant 0 : i32
    return %c0_i32, %c0_i32_0 : i32, i32
  }
  func.func @transform_1(%arg0: i32, %arg1: memref<32xi32, #tpu.memory_space<smem>>) -> (i32, i32) {
    %c0_i32 = arith.constant 0 : i32
    %c0_i32_0 = arith.constant 0 : i32
    %c0_i32_1 = arith.constant 0 : i32
    return %c0_i32, %c0_i32_0 : i32, i32
  }
  func.func @transform_2(%arg0: i32, %arg1: memref<32xi32, #tpu.memory_space<smem>>) -> (i32, i32) {
    %c0_i32 = arith.constant 0 : i32
    %c0_i32_0 = arith.constant 0 : i32
    %c0_i32_1 = arith.constant 0 : i32
    return %c0_i32, %c0_i32_0 : i32, i32
  }
  func.func @transform_3(%arg0: i32, %arg1: memref<32xi32, #tpu.memory_space<smem>>) -> (i32, i32) {
    %c0_i32 = arith.constant 0 : i32
    %c0_i32_0 = arith.constant 0 : i32
    %c0_i32_1 = arith.constant 0 : i32
    return %c0_i32, %c0_i32_0 : i32, i32
  }
  func.func @transform_4(%arg0: i32, %arg1: memref<32xi32, #tpu.memory_space<smem>>) -> (i32, i32) {
    %c0_i32 = arith.constant 0 : i32
    %c0_i32_0 = arith.constant 0 : i32
    %c0_i32_1 = arith.constant 0 : i32
    return %c0_i32, %c0_i32_0 : i32, i32
  }
  func.func @transform_5(%arg0: i32, %arg1: memref<32xi32, #tpu.memory_space<smem>>) -> (i32, i32) {
    %c0_i32 = arith.constant 0 : i32
    %c0_i32_0 = arith.constant 0 : i32
    %c0_i32_1 = arith.constant 0 : i32
    return %c0_i32, %c0_i32_0 : i32, i32
  }
}

</mosaic_0001>

<bundles_post_ra>
// kernel: tpu_custom_call.1
= control target key start
LH: loop header
LB: loop body
LE: loop exit
PB: predicated region body
PF: predicated region fallthrough
CT: control target
= control target key end

     0   :  { %s1656_s0 = inlined_call_operand.hbm [shape: s32[32], index: 0, kind: input, shape index: {}]   ;;  %s1657_s1 = inlined_call_operand.hbm [shape: f32[16,128], index: 1, kind: input, shape index: {}]   ;;  %s1658_s2 = inlined_call_operand.hbm [shape: bf16[1024,128], index: 2, kind: input, shape index: {}]   ;;  %s1659_s3 = inlined_call_operand.vmem [shape: f32[1,128], index: 3, kind: input, shape index: {}]   ;;  %s1660_s4 = inlined_call_operand.hbm [shape: bf16[128,128], index: 4, kind: input, shape index: {}]   ;;  %s1661_s5 = inlined_call_operand.vmem [shape: f32[1,128], index: 5, kind: input, shape index: {}]   ;;  %s1662_s6 = inlined_call_operand.hbm [shape: f32[1,128], index: 6, kind: output, shape index: {}]  }
   0x1   :  { %s1372_s23 = scalar_lea.hbm %s1656_s0, 16 }
   0x2   :  { %p1373_p0 = scmp.ne.s32.totalorder %s1656_s0, %s1372_s23  ;;  %p1376_p1 = scmp.lt.u32.totalorder %s1372_s23, %s1656_s0 }
   0x4   :  { %p1378_p2 = pnand %p1376_p1, %p1373_p0 }
   0x6   :  { %1381 = shalt.err (!%p1378_p2)  }
   0x7   :  { %s1478_s28 = smov [#allocation4]  }
   0x8   :  { %12 = dma.hbm_to_smem %s1656_s0, 16, %s1478_s28, [#allocation3] }
   0x9   :  { %1470 = dma.done.wait [#allocation3], 16 }
   0xa   :  { %1471 = vsyncadd [#allocation3], 4294967280 }
   0xb   :  { %14 = sfence }
   0xc   :  { %15 = vsyncpa [#allocation6], 0 }
   0xd   :  { %16 = vsyncpa [#allocation9], 0 }
   0xe   :  { %17 = vsyncpa [#allocation7], 0  ;;  %s1479_s7 = smov [#allocation8]   ;;  %s1382_s11 = scalar_lea.hbm %s1658_s2, 8192 }
   0xf   :  { %s35_s8 = sshll.u32 %s1479_s7, 4  ;;  %p1383_p3 = scmp.ne.s32.totalorder %s1658_s2, %s1382_s11  ;;  %s36_s8 = int_to_ptr.vmem [resolvable:$true] %s35_s8 }
  0x10   :  { %p1386_p4 = scmp.lt.u32.totalorder %s1382_s11, %s1658_s2 }
  0x12   :  { %p1388_p5 = pnand %p1386_p4, %p1383_p3 }
  0x14   :  { %1391 = shalt.err (!%p1388_p5)
}
  0x15   :  { %s1392_s0 = scalar_lea.vmem %s36_s8, 8192  ;;  %p1397_p7 = scmp.lt.s32.totalorder %s36_s8, %s36_s8 }
  0x16   :  { %p1393_p6 = scmp.ne.s32.totalorder %s36_s8, %s1392_s0  ;;  %p1398_p8 = scmp.lt.s32.totalorder %s1392_s0, %s1392_s0 }
  0x18   :  { %p1399_p9 = por %p1398_p8, %p1397_p7 }
  0x1a   :  { %p1400_p10 = pnand %p1399_p9, %p1393_p6 }
  0x1c   :  { %1403 = shalt.err (!%p1400_p10)
}
  0x1d   :  { %s1480_s16 = smov 64   ;;  %s1481_s17 = smov 4  }
  0x1e   :  { %41 = dma.hbm_to_vmem [thread:$0]  %s1658_s2, 8192, %s36_s8, [#allocation9], %s1480_s16, %s1480_s16, %s1481_s17  }
  0x1f   :  { %s1482_s20 = smov [#allocation5]   ;;  %s1404_s24 = scalar_lea.hbm %s1657_s1, 256 }
  0x20   :  { %s23_s21 = sshll.u32 %s1482_s20, 4  ;;  %p1405_p11 = scmp.ne.s32.totalorder %s1657_s1, %s1404_s24  ;;  %s24_s21 = int_to_ptr.vmem [resolvable:$true] %s23_s21 }
  0x21   :  { %p1408_p12 = scmp.lt.u32.totalorder %s1404_s24, %s1657_s1 }
  0x23   :  { %p1410_p13 = pnand %p1408_p12, %p1405_p11 }
  0x25   :  { %1413 = shalt.err (!%p1410_p13)
}
  0x26   :  { %s1414_s29 = scalar_lea.vmem %s24_s21, 256  ;;  %p1419_p1 = scmp.lt.s32.totalorder %s24_s21, %s24_s21 }
  0x27   :  { %p1415_p0 = scmp.ne.s32.totalorder %s24_s21, %s1414_s29  ;;  %p1420_p2 = scmp.lt.s32.totalorder %s1414_s29, %s1414_s29 }
  0x29   :  { %p1421_p3 = por %p1420_p2, %p1419_p1 }
  0x2b   :  { %p1422_p4 = pnand %p1421_p3, %p1415_p0 }
  0x2d   :  { %1425 = shalt.err (!%p1422_p4)
}
  0x2e   :  { %s1483_s2 = smov 128   ;;  %s1484_s30 = smov 8  }
  0x2f   :  { %29 = dma.hbm_to_vmem [thread:$0]  %s1657_s1, 256, %s24_s21, [#allocation6], %s1483_s2, %s1483_s2, %s1484_s30  }
  0x30   :  { %s1485_s9 = smov [#allocation10]   ;;  %s1426_s13 = scalar_lea.hbm %s1660_s4, 1024 }
  0x31   :  { %s49_s10 = sshll.u32 %s1485_s9, 4  ;;  %p1427_p5 = scmp.ne.s32.totalorder %s1660_s4, %s1426_s13  ;;  %s50_s10 = int_to_ptr.vmem [resolvable:$true] %s49_s10 }
  0x32   :  { %p1430_p6 = scmp.lt.u32.totalorder %s1426_s13, %s1660_s4 }
  0x34   :  { %p1432_p7 = pnand %p1430_p6, %p1427_p5 }
  0x36   :  { %1435 = shalt.err (!%p1432_p7)
}
  0x37   :  { %s1436_s19 = scalar_lea.vmem %s50_s10, 1024  ;;  %p1441_p9 = scmp.lt.s32.totalorder %s50_s10, %s50_s10 }
  0x38   :  { %p1437_p8 = scmp.ne.s32.totalorder %s50_s10, %s1436_s19  ;;  %p1442_p10 = scmp.lt.s32.totalorder %s1436_s19, %s1436_s19 }
  0x3a   :  { %p1443_p11 = por %p1442_p10, %p1441_p9 }
  0x3c   :  { %p1444_p12 = pnand %p1443_p11, %p1437_p8 }
  0x3e   :  { %1447 = shalt.err (!%p1444_p12)
}
  0x3f   :  { %55 = dma.hbm_to_vmem [thread:$0]  %s1660_s4, 1024, %s50_s10, [#allocation9], %s1480_s16, %s1480_s16, %s1481_s17  }
  0x40   :  { %1472 = dma.done.wait [#allocation6], 256  }
  0x41   :  { %1473 = vsyncadd [#allocation6], 4294967040 }
  0x42   :  { %1474 = dma.done.wait [#allocation9], 9216  }
  0x43   :  { %1475 = vsyncadd [#allocation9], 4294958080  ;;  %s1578_s21 = sld [smem:[#allocation4]]  ;;  %s1580_s22 = sld [smem:[#allocation4 + $0x1]]  ;;  %v1296_v0 = vld [vmem:[#allocation8 + $0x40] sm:$0xff]   ;;  %v1300_v4 = vld [vmem:[#allocation8 + $0x48] sm:$0xff]  }
  0x44   :  { %s1582_s23 = sld [smem:[#allocation4 + $0x8]]  ;;  %s1584_s24 = sld [smem:[#allocation4 + $0x9]]  ;;  %v1297_v1 = vld [vmem:[#allocation8 + $0xc0] sm:$0xff]   ;;  %1168 = vmatprep.subr.bf16.mxu0 %v1296_v0  ;;  %v1301_v5 = vld [vmem:[#allocation8 + $0xc8] sm:$0xff]   ;;  %v1304_v8 = vld [vmem:[#allocation8 + $0x50] sm:$0xff]   ;;  %vm1487_vm0 = vmmov 0  }
  0x45   :  { %s1586_s25 = sld [smem:[#allocation4 + $0x10]]  ;;  %s1588_s26 = sld [smem:[#allocation4 + $0x11]]  ;;  %v1298_v2 = vld [vmem:[#allocation8] sm:$0xff]   ;;  %1190 = vmatprep.subr.bf16.mxu1 %v1297_v1  ;;  %v1302_v6 = vld [vmem:[#allocation8 + $0x8] sm:$0xff]   ;;  %v1305_v9 = vld [vmem:[#allocation8 + $0xd0] sm:$0xff]   ;;  %vm900_vm1 = vcmask 1043456  }
  0x46   :  { %s1590_s27 = sld [smem:[#allocation4 + $0x18]]  ;;  %s1592_s28 = sld [smem:[#allocation4 + $0x19]]  ;;  %v1299_v3 = vld [vmem:[#allocation8 + $0x80] sm:$0xff]   ;;  %1169 = vmatpush3.bf16.msra.mxu0 %v1298_v2  ;;  %v1303_v7 = vld [vmem:[#allocation8 + $0x88] sm:$0xff]   ;;  %v1306_v10 = vld [vmem:[#allocation8 + $0x10] sm:$0xff]  }
  0x47   :  { %s1594_s4 = sld [smem:[#allocation4 + $0x2]]  ;;  %s1596_s16 = sld [smem:[#allocation4 + $0x3]]  ;;  %1191 = vmatpush3.bf16.msra.mxu1 %v1299_v3  ;;  %1170 = vmatprep.subr.bf16.mxu0 %v1300_v4  ;;  %v1307_v11 = vld [vmem:[#allocation8 + $0x90] sm:$0xff]   ;;  %v1308_v12 = vld [vmem:[#allocation8 + $0x58] sm:$0xff]   ;;  %v1312_v16 = vld [vmem:[#allocation8 + $0x60] sm:$0xff]  }
  0x48   :  { %s1598_s17 = sld [smem:[#allocation4 + $0xa]]  ;;  %s1600_s29 = sld [smem:[#allocation4 + $0xb]]  ;;  %1192 = vmatprep.subr.bf16.mxu1 %v1301_v5  ;;  %v1309_v13 = vld [vmem:[#allocation8 + $0xd8] sm:$0xff]   ;;  %v1313_v17 = vld [vmem:[#allocation8 + $0xe0] sm:$0xff]   ;;  %v1316_v20 = vld [vmem:[#allocation8 + $0x68] sm:$0xff]  }
  0x49   :  { %v1310_v14 = vld [vmem:[#allocation8 + $0x18] sm:$0xff]   ;;  %v1314_v18 = vld [vmem:[#allocation8 + $0x20] sm:$0xff]   ;;  %v1317_v21 = vld [vmem:[#allocation8 + $0xe8] sm:$0xff]   ;;  %s69_s2 = scalar_lea.vmem [#allocation5], %s1578_s21  ;;  %s73_s30 = scalar_lea.vmem [#allocation5], %s1580_s22 }
  0x4a   :  { %1171 = vmatpush3.bf16.msra.mxu0 %v1302_v6  ;;  %v1311_v15 = vld [vmem:[#allocation8 + $0x98] sm:$0xff]   ;;  %v1315_v19 = vld [vmem:[#allocation8 + $0xa0] sm:$0xff]   ;;  %v1318_v22 = vld [vmem:[#allocation8 + $0x28] sm:$0xff]   ;;  %s101_s7 = scalar_lea.vmem [#allocation5], %s1582_s23  ;;  %s105_s8 = scalar_lea.vmem [#allocation5], %s1584_s24 }
  0x4b   :  { %1193 = vmatpush3.bf16.msra.mxu1 %v1303_v7  ;;  %1172 = vmatprep.subr.bf16.mxu0 %v1304_v8  ;;  %v1319_v23 = vld [vmem:[#allocation8 + $0xa8] sm:$0xff]   ;;  %v1320_v24 = vld [vmem:[#allocation8 + $0x70] sm:$0xff]   ;;  %v1324_v28 = vld [vmem:[#allocation8 + $0x78] sm:$0xff]   ;;  %s133_s9 = scalar_lea.vmem [#allocation5], %s1586_s25  ;;  %s137_s10 = scalar_lea.vmem [#allocation5], %s1588_s26 }
  0x4c   :  { %1194 = vmatprep.subr.bf16.mxu1 %v1305_v9  ;;  %v1321_v25 = vld [vmem:[#allocation8 + $0xf0] sm:$0xff]   ;;  %v1325_v29 = vld [vmem:[#allocation8 + $0xf8] sm:$0xff]   ;;  %s165_s11 = scalar_lea.vmem [#allocation5], %s1590_s27  ;;  %s169_s12 = scalar_lea.vmem [#allocation5], %s1592_s28  ;;  %v1330_v44 = vld [vmem:[#allocation8 + $0x140] sm:$0xff]  }
  0x4d   :  { %v1322_v26 = vld [vmem:[#allocation8 + $0x30] sm:$0xff]   ;;  %v1326_v30 = vld [vmem:[#allocation8 + $0x38] sm:$0xff]   ;;  %s77_s13 = scalar_lea.vmem [#allocation5], %s1594_s4  ;;  %s81_s14 = scalar_lea.vmem [#allocation5], %s1596_s16  ;;  %v1331_v45 = vld [vmem:[#allocation8 + $0x1c0] sm:$0xff]  }
  0x4e   :  { %1173 = vmatpush3.bf16.msra.mxu0 %v1306_v10  ;;  %v1323_v27 = vld [vmem:[#allocation8 + $0xb0] sm:$0xff]   ;;  %v1327_v31 = vld [vmem:[#allocation8 + $0xb8] sm:$0xff]   ;;  %s109_s15 = scalar_lea.vmem [#allocation5], %s1598_s17  ;;  %s113_s0 = scalar_lea.vmem [#allocation5], %s1600_s29  ;;  %v1332_v54 = vld [vmem:[#allocation8 + $0x100] sm:$0xff]  }
  0x4f   :  { %1195 = vmatpush3.bf16.msra.mxu1 %v1307_v11  ;;  %1174 = vmatprep.subr.bf16.mxu0 %v1308_v12  ;;  %v70_v32 = vld [vmem:[%s69_s2] sm:$0x1]  ;;  %s1081_s18 = sld [smem:[#allocation4 + $0x12]]  ;;  %s1082_s19 = sld [smem:[#allocation4 + $0x13]]  ;;  %v1334_v55 = vld [vmem:[#allocation8 + $0x148] sm:$0xff]   ;;  %v1342_v62 = vld [vmem:[#allocation8 + $0x158] sm:$0xff]  }
  0x50   :  { %1196 = vmatprep.subr.bf16.mxu1 %v1309_v13  ;;  %v74_v33 = vld [vmem:[%s73_s30] sm:$0x1]  ;;  %71 = vst [vmem:[#allocation2] sm:$0x1] %v70_v32  ;;  %s1089_s1 = sld [smem:[#allocation4 + $0x1a]]  ;;  %s1090_s20 = sld [smem:[#allocation4 + $0x1b]] }
  0x51   :  { %v102_v34 = vld [vmem:[%s101_s7] sm:$0x1]  ;;  %75 = vst [vmem:[#allocation2 + $0x4] sm:$0x1] %v74_v33  ;;  %v1336_v56 = vld [vmem:[#allocation8 + $0x108] sm:$0xff]   ;;  %v1333_v0 = vld [vmem:[#allocation8 + $0x180] sm:$0xff]  }
  0x52   :  { %1175 = vmatpush3.bf16.msra.mxu0 %v1310_v14  ;;  %103 = vst [vmem:[#allocation2 + $0x1] sm:$0x1] %v102_v34  ;;  %v106_v35 = vld [vmem:[%s105_s8] sm:$0x1]  ;;  %v1335_v1 = vld [vmem:[#allocation8 + $0x1c8] sm:$0xff]   ;;  %v1344_v3 = vld [vmem:[#allocation8 + $0x118] sm:$0xff]  }
  0x53   :  { %1197 = vmatpush3.bf16.msra.mxu1 %v1311_v15  ;;  %1176 = vmatprep.subr.bf16.mxu0 %v1312_v16  ;;  %v134_v36 = vld [vmem:[%s133_s9] sm:$0x1]  ;;  %107 = vst [vmem:[#allocation2 + $0x5] sm:$0x1] %v106_v35  ;;  %v1337_v2 = vld [vmem:[#allocation8 + $0x188] sm:$0xff]   ;;  %v1346_v4 = vld [vmem:[#allocation8 + $0x160] sm:$0xff]  }
  0x54   :  { %1198 = vmatprep.subr.bf16.mxu1 %v1313_v17  ;;  %v138_v37 = vld [vmem:[%s137_s10] sm:$0x1]  ;;  %135 = vst [vmem:[#allocation2 + $0x2] sm:$0x1] %v134_v36  ;;  %s1067_s25 = sld [smem:[#allocation4 + $0x4]]  ;;  %v1348_v6 = vld [vmem:[#allocation8 + $0x120] sm:$0xff]  }
  0x55   :  { %139 = vst [vmem:[#allocation2 + $0x6] sm:$0x1] %v138_v37  ;;  %v166_v38 = vld [vmem:[%s165_s11] sm:$0x1]  ;;  %s141_s21 = scalar_lea.vmem [#allocation5], %s1081_s18  ;;  %s145_s22 = scalar_lea.vmem [#allocation5], %s1082_s19 }
  0x56   :  { %1177 = vmatpush3.bf16.msra.mxu0 %v1314_v18  ;;  %v170_v39 = vld [vmem:[%s169_s12] sm:$0x1]  ;;  %167 = vst [vmem:[#allocation2 + $0x3] sm:$0x1] %v166_v38  ;;  %s173_s23 = scalar_lea.vmem [#allocation5], %s1089_s1  ;;  %s177_s24 = scalar_lea.vmem [#allocation5], %s1090_s20 }
  0x57   :  { %1199 = vmatpush3.bf16.msra.mxu1 %v1315_v19  ;;  %1178 = vmatprep.subr.bf16.mxu0 %v1316_v20  ;;  %v78_v40 = vld [vmem:[%s77_s13] sm:$0x1]  ;;  %171 = vst [vmem:[#allocation2 + $0x7] sm:$0x1] %v170_v39  ;;  %v1350_v7 = vld [vmem:[#allocation8 + $0x168] sm:$0xff]   ;;  %v1343_v9 = vld [vmem:[#allocation8 + $0x1d8] sm:$0xff]  }
  0x58   :  { %1200 = vmatprep.subr.bf16.mxu1 %v1317_v21  ;;  %79 = vst [vmem:[#allocation2 + $0x8] sm:$0x1] %v78_v40  ;;  %v82_v41 = vld [vmem:[%s81_s14] sm:$0x1]  ;;  %v1352_v10 = vld [vmem:[#allocation8 + $0x128] sm:$0xff]   ;;  %v1345_v12 = vld [vmem:[#allocation8 + $0x198] sm:$0xff]  }
  0x59   :  { %v110_v42 = vld [vmem:[%s109_s15] sm:$0x1]  ;;  %83 = vst [vmem:[#allocation2 + $0xc] sm:$0x1] %v82_v41  ;;  %v1347_v13 = vld [vmem:[#allocation8 + $0x1e0] sm:$0xff]   ;;  %v1351_v16 = vld [vmem:[#allocation8 + $0x1e8] sm:$0xff]  }
  0x5a   :  { %1179 = vmatpush3.bf16.msra.mxu0 %v1318_v22  ;;  %v114_v43 = vld [vmem:[%s113_s0] sm:$0x1]  ;;  %111 = vst [vmem:[#allocation2 + $0x9] sm:$0x1] %v110_v42  ;;  %v1349_v14 = vld [vmem:[#allocation8 + $0x1a0] sm:$0xff]   ;;  %v1358_v17 = vld [vmem:[#allocation8 + $0x178] sm:$0xff]  }
  0x5b   :  { %1201 = vmatpush3.bf16.msra.mxu1 %v1319_v23  ;;  %1180 = vmatprep.subr.bf16.mxu0 %v1320_v24  ;;  %115 = vst [vmem:[#allocation2 + $0xd] sm:$0x1] %v114_v43  ;;  %v142_v48 = vld [vmem:[%s141_s21] sm:$0x1]  ;;  %v1360_v18 = vld [vmem:[#allocation8 + $0x138] sm:$0xff]   ;;  %s85_s26 = scalar_lea.vmem [#allocation5], %s1067_s25 }
  0x5c   :  { %1202 = vmatprep.subr.bf16.mxu1 %v1321_v25  ;;  %v146_v49 = vld [vmem:[%s145_s22] sm:$0x1]  ;;  %143 = vst [vmem:[#allocation2 + $0xa] sm:$0x1] %v142_v48  ;;  %s1068_s27 = sld [smem:[#allocation4 + $0x5]]  ;;  %s1075_s28 = sld [smem:[#allocation4 + $0xc]] }
  0x5d   :  { %147 = vst [vmem:[#allocation2 + $0xe] sm:$0x1] %v146_v49  ;;  %v174_v51 = vld [vmem:[%s173_s23] sm:$0x1]  ;;  %v1353_v20 = vld [vmem:[#allocation8 + $0x1a8] sm:$0xff]   ;;  %s1076_s4 = sld [smem:[#allocation4 + $0xd]] }
  0x5e   :  { %1181 = vmatpush3.bf16.msra.mxu0 %v1322_v26  ;;  %v196_v46 = vld [vmem:[#allocation2] sm:$0xff]  ;;  %175 = vst [vmem:[#allocation2 + $0xb] sm:$0x1] %v174_v51  ;;  %s1083_s16 = sld [smem:[#allocation4 + $0x14]]  ;;  %s1614_s17 = sld [smem:[#allocation4 + $0x15]]  ;;  %v1359_v23 = vld [vmem:[#allocation8 + $0x1f8] sm:$0xff]  }
  0x5f   :  { %1203 = vmatpush3.bf16.msra.mxu1 %v1323_v27  ;;  %1182 = vmatprep.subr.bf16.mxu0 %v1324_v28  ;;  %v204_v47 = vcombine.high %v196_v46, %v196_v46  ;;  %v212_v50 = vpack.c.bf16 %v196_v46, %v196_v46  ;;  %v178_v52 = vld [vmem:[%s177_s24] sm:$0x1]  ;;  %s1616_s29 = sld [smem:[#allocation4 + $0x1c]]  ;;  %s1618_s2 = sld [smem:[#allocation4 + $0x1d]]  ;;  %v1361_v28 = vld [vmem:[#allocation8 + $0x1b8] sm:$0xff]   ;;  %v1364_v48 = vld [vmem:[#allocation10] sm:$0xff]  }
  0x60   :  { %1204 = vmatprep.subr.bf16.mxu1 %v1325_v29  ;;  %179 = vst [vmem:[#allocation2 + $0xf] sm:$0x1] %v178_v52  ;;  %v1338_v57 = vld [vmem:[#allocation8 + $0x150] sm:$0xff]   ;;  %s1620_s30 = sld [smem:[#allocation4 + $0x6]]  ;;  %s1622_s7 = sld [smem:[#allocation4 + $0x7]]  ;;  %v1486_v49 = vmov 0.0  }
  0x61   :  { %v213_v53 = vpack.c.bf16 %v204_v47, %v204_v47  ;;  %v1340_v60 = vld [vmem:[#allocation8 + $0x110] sm:$0xff]   ;;  %s1624_s8 = sld [smem:[#allocation4 + $0xe]]  ;;  %s1626_s9 = sld [smem:[#allocation4 + $0xf]]  ;;  %v1367_v52 = vld [vmem:[#allocation10 + $0x18] sm:$0xff]  }
  0x62   :  { %1183 = vmatpush3.bf16.msra.mxu0 %v1326_v30  ;;  %v1339_v5 = vld [vmem:[#allocation8 + $0x1d0] sm:$0xff]   ;;  %s1628_s10 = sld [smem:[#allocation4 + $0x16]]  ;;  %s89_s11 = scalar_lea.vmem [#allocation5], %s1068_s27 }
  0x63   :  { %1205 = vmatpush3.bf16.msra.mxu1 %v1327_v31  ;;  %1212 = vmatprep.subr.bf16.mxu0 %v1330_v44  ;;  %v1341_v8 = vld [vmem:[#allocation8 + $0x190] sm:$0xff]   ;;  %s117_s12 = scalar_lea.vmem [#allocation5], %s1075_s28  ;;  %s121_s13 = scalar_lea.vmem [#allocation5], %s1076_s4 }
  0x64   :  { %1234 = vmatprep.subr.bf16.mxu1 %v1331_v45  ;;  %771 = vmatprep.mubr.bf16.mxu0 %v213_v53  ;;  %v1354_v11 = vld [vmem:[#allocation8 + $0x170] sm:$0xff]   ;;  %s149_s14 = scalar_lea.vmem [#allocation5], %s1083_s16  ;;  %s153_s15 = scalar_lea.vmem [#allocation5], %s1614_s17  ;;  %v1368_v53 = vld [vmem:[#allocation10 + $0x20] sm:$0xff]  }
  0x65   :  { %772 = vmatmul.mubr.bf16.vlgmr.msra.gmra.mrb[0].mxu0 %v212_v50  ;;  %v1356_v15 = vld [vmem:[#allocation8 + $0x130] sm:$0xff]   ;;  %s181_s0 = scalar_lea.vmem [#allocation5], %s1616_s29  ;;  %s185_s18 = scalar_lea.vmem [#allocation5], %s1618_s2  ;;  %v1365_v50 = vld [vmem:[#allocation10 + $0x8] sm:$0xff]  }
  0x66   :  { %1213 = vmatpush3.bf16.msra.mxu0 %v1332_v54  ;;  %v86_v19 = vld [vmem:[%s85_s26] sm:$0x1]  ;;  %s93_s19 = scalar_lea.vmem [#allocation5], %s1620_s30  ;;  %s97_s1 = scalar_lea.vmem [#allocation5], %s1622_s7  ;;  %v1369_v54 = vld [vmem:[#allocation10 + $0x28] sm:$0xff]  }
  0x67   :  { %1214 = vmatprep.subr.bf16.mxu0 %v1334_v55  ;;  %v197_v58 = vld [vmem:[#allocation2 + $0x8] sm:$0xff]  ;;  %87 = vst [vmem:[#allocation2 + $0x10] sm:$0x1] %v86_v19  ;;  %v1355_v21 = vld [vmem:[#allocation8 + $0x1f0] sm:$0xff]   ;;  %s125_s20 = scalar_lea.vmem [#allocation5], %s1624_s8  ;;  %s129_s21 = scalar_lea.vmem [#allocation5], %s1626_s9 }
  0x68   :  { %v205_v59 = vcombine.high %v197_v58, %v197_v58  ;;  %v214_v61 = vpack.c.bf16 %v197_v58, %v197_v58  ;;  %v1357_v22 = vld [vmem:[#allocation8 + $0x1b0] sm:$0xff]   ;;  %s157_s22 = scalar_lea.vmem [#allocation5], %s1628_s10  ;;  %s1086_s23 = sld [smem:[#allocation4 + $0x17]] }
  0x69   :  { %v90_v24 = vld [vmem:[%s89_s11] sm:$0x1]  ;;  %s1093_s24 = sld [smem:[#allocation4 + $0x1e]]  ;;  %s1094_s25 = sld [smem:[#allocation4 + $0x1f]] }
  0x6a   :  { %1215 = vmatpush3.bf16.msra.mxu0 %v1336_v56  ;;  %v215_v63 = vpack.c.bf16 %v205_v59, %v205_v59  ;;  %v118_v25 = vld [vmem:[%s117_s12] sm:$0x1]  ;;  %91 = vst [vmem:[#allocation2 + $0x14] sm:$0x1] %v90_v24  ;;  %v1371_v56 = vld [vmem:[#allocation10 + $0x38] sm:$0xff]   ;;  %s1488_s29 = smov [#allocation11]  }
  0x6b   :  { %1216 = vmatprep.subr.bf16.mxu0 %v1338_v57  ;;  %119 = vst [vmem:[#allocation2 + $0x11] sm:$0x1] %v118_v25  ;;  %v122_v26 = vld [vmem:[%s121_s13] sm:$0x1]  ;;  %s1022_s2 = sshll.u32 %s1488_s29, 4  ;;  %s1023_s2 = int_to_ptr.vmem [resolvable:$true] %s1022_s2 }
  0x6c   :  { %811 = vmatprep.mubr.bf16.mxu1 %v215_v63  ;;  %v150_v27 = vld [vmem:[%s149_s14] sm:$0x1]  ;;  %123 = vst [vmem:[#allocation2 + $0x15] sm:$0x1] %v122_v26  ;;  %s1448_s30 = scalar_lea.vmem %s1023_s2, 16  ;;  %s1452_s7 = scalar_lea.vmem %s1023_s2, 32 }
  0x6d   :  { %812 = vmatmul.mubr.bf16.vlgmr.msra.gmra.mrb[0].mxu1 %v214_v61  ;;  %151 = vst [vmem:[#allocation2 + $0x12] sm:$0x1] %v150_v27  ;;  %v154_v29 = vld [vmem:[%s153_s15] sm:$0x1]  ;;  %p1449_p13 = scmp.ne.s32.totalorder %s1023_s2, %s1448_s30  ;;  %p1453_p0 = scmp.lt.s32.totalorder %s1023_s2, %s1023_s2 }
  0x6e   :  { %1217 = vmatpush3.bf16.msra.mxu0 %v1340_v60  ;;  %1235 = vmatpush3.bf16.msra.mxu1 %v1333_v0  ;;  %v182_v30 = vld [vmem:[%s181_s0] sm:$0x1]  ;;  %155 = vst [vmem:[#allocation2 + $0x16] sm:$0x1] %v154_v29  ;;  %s161_s26 = scalar_lea.vmem [#allocation5], %s1086_s23  ;;  %p1454_p1 = scmp.lt.s32.totalorder %s1452_s7, %s1448_s30 }
  0x6f   :  { %1218 = vmatprep.subr.bf16.mxu0 %v1342_v62  ;;  %1236 = vmatprep.subr.bf16.mxu1 %v1335_v1  ;;  %183 = vst [vmem:[#allocation2 + $0x13] sm:$0x1] %v182_v30  ;;  %v186_v31 = vld [vmem:[%s185_s18] sm:$0x1]  ;;  %s189_s27 = scalar_lea.vmem [#allocation5], %s1093_s24  ;;  %s193_s28 = scalar_lea.vmem [#allocation5], %s1094_s25 }
  0x70   :  { %v94_v32 = vld [vmem:[%s93_s19] sm:$0x1]  ;;  %187 = vst [vmem:[#allocation2 + $0x17] sm:$0x1] %v186_v31  ;;  %p1455_p2 = por %p1454_p1, %p1453_p0 }
  0x71   :  { %95 = vst [vmem:[#allocation2 + $0x18] sm:$0x1] %v94_v32  ;;  %v98_v33 = vld [vmem:[%s97_s1] sm:$0x1] }
  0x72   :  { %1219 = vmatpush3.bf16.msra.mxu0 %v1344_v3  ;;  %1237 = vmatpush3.bf16.msra.mxu1 %v1337_v2  ;;  %v126_v34 = vld [vmem:[%s125_s20] sm:$0x1]  ;;  %99 = vst [vmem:[#allocation2 + $0x1c] sm:$0x1] %v98_v33  ;;  %p1456_p3 = pnand %p1455_p2, %p1449_p13 }
  0x73   :  { %1220 = vmatprep.subr.bf16.mxu0 %v1346_v4  ;;  %1238 = vmatprep.subr.bf16.mxu1 %v1339_v5  ;;  %127 = vst [vmem:[#allocation2 + $0x19] sm:$0x1] %v126_v34  ;;  %v130_v35 = vld [vmem:[%s129_s21] sm:$0x1] }
  0x74   :  { %v158_v36 = vld [vmem:[%s157_s22] sm:$0x1]  ;;  %131 = vst [vmem:[#allocation2 + $0x1d] sm:$0x1] %v130_v35 }
  0x75   :  { %159 = vst [vmem:[#allocation2 + $0x1a] sm:$0x1] %v158_v36  ;;  %v162_v39 = vld [vmem:[%s161_s26] sm:$0x1] }
  0x76   :  { %1221 = vmatpush3.bf16.msra.mxu0 %v1348_v6  ;;  %1239 = vmatpush3.bf16.msra.mxu1 %v1341_v8  ;;  %163 = vst [vmem:[#allocation2 + $0x1e] sm:$0x1] %v162_v39  ;;  %v190_v41 = vld [vmem:[%s189_s27] sm:$0x1] }
  0x77   :  { %1222 = vmatprep.subr.bf16.mxu0 %v1350_v7  ;;  %1240 = vmatprep.subr.bf16.mxu1 %v1343_v9  ;;  %v198_v37 = vld [vmem:[#allocation2 + $0x10] sm:$0xff]  ;;  %v194_v42 = vld [vmem:[%s193_s28] sm:$0x1]  ;;  %191 = vst [vmem:[#allocation2 + $0x1b] sm:$0x1] %v190_v41 }
  0x78   :  { %v206_v38 = vcombine.high %v198_v37, %v198_v37  ;;  %v216_v40 = vpack.c.bf16 %v198_v37, %v198_v37  ;;  %195 = vst [vmem:[#allocation2 + $0x1f] sm:$0x1] %v194_v42  ;;  %v1366_v51 = vld [vmem:[#allocation10 + $0x10] sm:$0xff]  }
  0x79   :  { %v1370_v55 = vld [vmem:[#allocation10 + $0x30] sm:$0xff]  }
  0x7a   :  { %1223 = vmatpush3.bf16.msra.mxu0 %v1352_v10  ;;  %1241 = vmatpush3.bf16.msra.mxu1 %v1345_v12  ;;  %v217_v43 = vpack.c.bf16 %v206_v38, %v206_v38  ;;  %v1095_v62 = vld [vmem:[%s1659_s3] ss:$0 sm:$0xff] }
  0x7b   :  { %1224 = vmatprep.subr.bf16.mxu0 %v1354_v11  ;;  %1242 = vmatprep.subr.bf16.mxu1 %v1347_v13 }
  0x7c   :  { %851 = vmatprep.mubr.bf16.mxu0 %v217_v43 }
  0x7e   :  { %1225 = vmatpush3.bf16.msra.mxu0 %v1356_v15  ;;  %1243 = vmatpush3.bf16.msra.mxu1 %v1349_v14 }
  0x7f   :  { %1226 = vmatprep.subr.bf16.mxu0 %v1358_v17  ;;  %1244 = vmatprep.subr.bf16.mxu1 %v1351_v16  ;;  %v199_v44 = vld [vmem:[#allocation2 + $0x18] sm:$0xff] }
  0x80   :  { %v207_v45 = vcombine.high %v199_v44, %v199_v44  ;;  %v218_v46 = vpack.c.bf16 %v199_v44, %v199_v44 }
  0x82   :  { %1227 = vmatpush3.bf16.msra.mxu0 %v1360_v18  ;;  %1245 = vmatpush3.bf16.msra.mxu1 %v1353_v20  ;;  %v219_v47 = vpack.c.bf16 %v207_v45, %v207_v45 }
  0x83   :  { %1246 = vmatprep.subr.bf16.mxu1 %v1355_v21  ;;  %1265 = vmatprep.subr.bf16.mxu0 %v1486_v49 }
  0x84   :  { %891 = vmatprep.mubr.bf16.mxu1 %v219_v47 }
  0x85   :  { %852 = vmatmul.mubr.bf16.vlgmr.msra.gmra.mrb[4].mxu0 %v216_v40 }
  0x86   :  { %1247 = vmatpush3.bf16.msra.mxu1 %v1357_v22  ;;  %1266 = vmatpush3.bf16.msra.mxu0 %v1364_v48 }
  0x87   :  { %1248 = vmatprep.subr.bf16.mxu1 %v1359_v23  ;;  %1267 = vmatprep.subr.bf16.mxu0 %v1486_v49 }
  0x88   :  { %1281 = vmatprep.mubr.msk.bf16.mxu0 %vm1487_vm0, %v1486_v49 }
  0x8a   :  { %1249 = vmatpush3.bf16.msra.mxu1 %v1361_v28  ;;  %1268 = vmatpush3.bf16.msra.mxu0 %v1365_v50  ;;  %v926_v28 = vld [vmem:[%s1661_s5] sm:$0x1] }
  0x8b   :  { %1269 = vmatprep.subr.bf16.mxu0 %v1486_v49 }
  0x8d   :  { %892 = vmatmul.mubr.bf16.vlgmr.msra.gmra.mrb[4].mxu1 %v218_v46 }
  0x8e   :  { %1270 = vmatpush3.bf16.msra.mxu0 %v1366_v51 }
  0x8f   :  { %1271 = vmatprep.subr.bf16.mxu0 %v1486_v49 }
  0x92   :  { %1272 = vmatpush3.bf16.msra.mxu0 %v1367_v52 }
  0x93   :  { %1273 = vmatprep.subr.bf16.mxu0 %v1486_v49 }
  0x96   :  { %1274 = vmatpush3.bf16.msra.mxu0 %v1368_v53 }
  0x97   :  { %1275 = vmatprep.subr.bf16.mxu0 %v1486_v49 }
  0x9a   :  { %1276 = vmatpush3.bf16.msra.mxu0 %v1369_v54 }
  0x9b   :  { %1277 = vmatprep.subr.bf16.mxu0 %v1486_v49 }
  0x9e   :  { %1278 = vmatpush3.bf16.msra.mxu0 %v1370_v55 }
  0x9f   :  { %1279 = vmatprep.subr.bf16.mxu0 %v1486_v49 }
  0xa2   :  { %1280 = vmatpush3.bf16.msra.mxu0 %v1371_v56 }
 0x138   :  { %v1184_v57 = vpop.f32.mrb[0].mxu0 }
 0x139   :  { %v1185_v58 = vpop.f32.mrb[1].mxu0 }
 0x13a   :  { %v1186_v59 = vadd.f32 %v1185_v58, %v1184_v57  ;;  %v1187_v60 = vpop.f32.mrb[2].mxu0 }
 0x13b   :  { %v1188_v61 = vpop.f32.mrb[3].mxu0 }
 0x13c   :  { %v774_v0 = vadd.f32 %v1186_v59, %v1095_v62 }
 0x140   :  { %v1206_v63 = vpop.f32.mrb[0].mxu1 }
 0x141   :  { %v1207_v1 = vpop.f32.mrb[1].mxu1 }
 0x142   :  { %v1208_v2 = vadd.f32 %v1207_v1, %v1206_v63  ;;  %v1209_v3 = vpop.f32.mrb[2].mxu1 }
 0x143   :  { %v1210_v4 = vpop.f32.mrb[3].mxu1 }
 0x144   :  { %v814_v5 = vadd.f32 %v1208_v2, %v774_v0 }
 0x158   :  { %v1228_v6 = vpop.f32.mrb[4].mxu0 }
 0x159   :  { %v1229_v7 = vpop.f32.mrb[5].mxu0 }
 0x15a   :  { %v1230_v8 = vadd.f32 %v1229_v7, %v1228_v6  ;;  %v1231_v9 = vpop.f32.mrb[6].mxu0 }
 0x15b   :  { %v1232_v10 = vpop.f32.mrb[7].mxu0 }
 0x15c   :  { %v854_v11 = vadd.f32 %v1230_v8, %v814_v5 }
 0x160   :  { %v1250_v12 = vpop.f32.mrb[4].mxu1 }
 0x161   :  { %v1251_v13 = vpop.f32.mrb[5].mxu1 }
 0x162   :  { %v1252_v14 = vadd.f32 %v1251_v13, %v1250_v12  ;;  %v1253_v15 = vpop.f32.mrb[6].mxu1 }
 0x163   :  { %v1254_v16 = vpop.f32.mrb[7].mxu1 }
 0x164   :  { %v894_v17 = vadd.f32 %v1252_v14, %v854_v11 }
 0x166   :  { %v899_v18 = vmax.f32 %v894_v17, 0.0 }
 0x168   :  { %v901_v19 = vsel %vm900_vm1, %v899_v18, 0.0 }
 0x169   :  { %v902_v20 = vrot.slane %v901_v19, 4 }
 0x16b   :  { %v903_v21 = vadd.f32 %v902_v20, %v901_v19 }
 0x16d   :  { %v904_v22 = vrot.slane %v903_v21, 2 }
 0x16f   :  { %v905_v23 = vadd.f32 %v904_v22, %v903_v21 }
 0x171   :  { %v906_v24 = vrot.slane %v905_v23, 1 }
 0x173   :  { %v907_v25 = vadd.f32 %v906_v24, %v905_v23 }
 0x175   :  { %v908_v26 = vmul.f32 0.25, %v907_v25 }
 0x177   :  { %v909_v27 = vpack.c.bf16 %v908_v26, %v908_v26 }
 0x179   :  { %1282 = vmatmul.mubr.bf16.vlgmr.msra.gmra.mrb[8].mxu0 %v909_v27 }
 0x24c   :  { %v1009_v29 = vpop.f32.mrb[8].mxu0 }
 0x24d   :  { %v1010_v30 = vadd.f32 %v1009_v29, %v926_v28  ;;  %v1283_v31 = vpop.f32.mrb[9].mxu0 }
 0x24e   :  { %v1012_v32 = vpop.f32.mrb[10].mxu0 }
 0x24f   :  { %1015 = vst [vmem:[#allocation11] sm:$0x1] %v1010_v30  ;;  %v1284_v33 = vpop.f32.mrb[11].mxu0 }
 0x250   :  { %1459 = shalt.err (!%p1456_p3)
}
 0x251   :  { %s1460_s5 = scalar_lea.hbm %s1662_s6, 16 }
 0x252   :  { %p1461_p4 = scmp.ne.s32.totalorder %s1662_s6, %s1460_s5  ;;  %p1464_p5 = scmp.lt.u32.totalorder %s1460_s5, %s1662_s6 }
 0x254   :  { %p1466_p6 = pnand %p1464_p5, %p1461_p4 }
 0x256   :  { %1469 = shalt.err (!%p1466_p6)
}
 0x257   :  { %1025 = dma.vmem_to_hbm [thread:$0]  %s1023_s2, 16, %s1662_s6, [#allocation7]  }
 0x258   :  { %1476 = dma.done.wait [#allocation7], 16  }
 0x259   :  { %1477 = vsyncadd [#allocation7], 4294967280 }
 0x25a   :  { %1029 = vsyncpa [#allocation6], 1 }
 0x25b   :  { %1030 = vsyncpa [#allocation9], 1 }
 0x25c   :  { %1031 = vsyncpa [#allocation7], 1 }

</bundles_post_ra>
